<compile_context>
chip_gen: v6e
topology: v6e:2x2x1
jax: 0.10.0
libtpu: 0.0.40
codegen_flags: <defaults>
</compile_context>

<pallas_src>
import jax
import jax.numpy as jnp
from jax.experimental import pallas as pl
from jax.experimental.pallas import tpu as pltpu


def _cdiv(a: int, b: int) -> int:
    return -(-a // b)


def _kl_ref(mu, logvar):
    """Pure-JAX reference / tiny-input fast path."""
    m = mu.astype(jnp.float32)
    lv = logvar.astype(jnp.float32)
    return -0.5 * jnp.mean(1.0 + lv - m * m - jnp.exp(lv))


def _num_tensorcores() -> int:
    """Best-effort TensorCores-per-chip (2 on v7x, 1 on v5e/v6e)."""
    try:
        info = pltpu.get_tpu_info()
        for name in ("num_cores", "core_count", "num_tensorcores",
                     "tensorcore_count", "cores_per_chip"):
            n = getattr(info, name, None)
            if isinstance(n, int) and 1 <= n <= 8:
                return n
    except Exception:
        pass
    return 1


def _make_kernel(r_tile: int, lane: int, tiles_per_part: int,
                 valid_rows: int, has_ragged: bool):
    groups = r_tile // 8

    def kernel(mu_ref, logvar_ref, out_ref, acc_ref):
        p = pl.program_id(0)
        t = pl.program_id(1)

        @pl.when(t == 0)
        def _init():
            acc_ref[...] = jnp.zeros_like(acc_ref)

        # Cast to f32 in-VMEM (inputs may be bf16 in HBM; v5e has no bf16 VPU).
        mu = mu_ref[...].astype(jnp.float32)
        lv = logvar_ref[...].astype(jnp.float32)
        term = 1.0 + lv - mu * mu - jnp.exp(lv)

        def accumulate(x):
            # Pure VPU vector adds: reshape is a no-op re-tiling (trailing
            # (8, lane) is layout-aligned), leading-axis sum adds vreg blocks.
            acc_ref[...] += x.reshape(groups, 8, lane).sum(axis=0)

        if has_ragged:
            ti = p * tiles_per_part + t          # nominal (unclamped) tile idx
            row0 = ti * r_tile
            is_full = row0 + r_tile <= valid_rows

            @pl.when(is_full)
            def _full():
                accumulate(term)

            @pl.when(jnp.logical_not(is_full))
            def _ragged():
                # Rows beyond the real array are undefined values from the
                # partial edge block (or a duplicated clamped block) -> mask.
                row_ids = row0 + jax.lax.broadcasted_iota(
                    jnp.int32, (r_tile, lane), 0)
                accumulate(jnp.where(row_ids < valid_rows, term, 0.0))
        else:
            accumulate(term)

        @pl.when(t == pl.num_programs(1) - 1)
        def _finalize():
            out_ref[...] = acc_ref[...]          # lane-dense (8, lane) slab

    return kernel


def kl_div(mu, logvar, *, target_tile_elems: int = 1024 * 512,
           max_lane: int = 4096):
    """-0.5 * mean(1 + logvar - mu**2 - exp(logvar)) via a Pallas streaming
    reduction.  mu / logvar: same-shaped arrays (any rank, any float dtype).
    Returns an f32 device scalar."""
    assert mu.shape == logvar.shape, "mu and logvar must have the same shape"
    count = int(mu.size)

    # ---- tiny inputs: XLA fuses a few-KB elementwise+reduce better than a
    # pallas_call launch (plus its layout plumbing).
    if count < 2048:
        return _kl_ref(mu, logvar)

    # ---- lane-dense 2-D view, no full-array pad in the common case --------
    trailing = int(mu.shape[-1])
    lane = None
    if trailing % 128 == 0 and 128 <= trailing <= max_lane:
        lane = trailing                       # free rank-collapse reshape
        mu2, lv2 = mu.reshape(-1, lane), logvar.reshape(-1, lane)
    else:
        for cand in (512, 256, 128):
            if count % cand == 0:
                lane = cand
                break
        if lane is None:
            # Rare: count not a multiple of 128. Minimal (<128 elem) zero pad;
            # zeros contribute exactly 0 to the KL sum (1 + 0 - 0 - e^0 = 0).
            lane = 128
            pad = (-count) % 128
            mu2 = jnp.pad(mu.reshape(-1), (0, pad)).reshape(-1, lane)
            lv2 = jnp.pad(logvar.reshape(-1), (0, pad)).reshape(-1, lane)
        else:
            mu2, lv2 = mu.reshape(-1, lane), logvar.reshape(-1, lane)

    rows = int(mu2.shape[0])
    if rows < 8:
        return _kl_ref(mu, logvar)            # degenerate layout; tiny anyway

    # ---- tiling ------------------------------------------------------------
    # ~2 MiB f32 per input per buffer; 16-row alignment keeps bf16 vregs clean.
    r_cap = max(16, (target_tile_elems // lane) // 16 * 16)
    if rows >= r_cap:
        r_tile = r_cap
    else:
        r_tile = max(8, (rows // 8) * 8)      # single (nearly) full tile

    n_tiles = _cdiv(rows, r_tile)
    cores = _num_tensorcores()
    parts = cores if (cores > 1 and n_tiles >= cores) else 1
    tiles_per_part = _cdiv(n_tiles, parts)
    has_ragged = (n_tiles * r_tile != rows) or (parts * tiles_per_part != n_tiles)
    last_tile = n_tiles - 1

    def in_map(p, t):
        # Clamp duplicated trailing tiles of a part onto the last real tile;
        # the in-kernel row mask zeroes their contribution.
        return (jnp.minimum(p * tiles_per_part + t, last_tile), 0)

    itemsize = jnp.dtype(mu.dtype).itemsize
    cost = pl.CostEstimate(
        flops=6 * count,
        transcendentals=count,
        bytes_accessed=2 * count * itemsize + 8 * lane * parts * 4,
    )

    out = pl.pallas_call(
        _make_kernel(r_tile, lane, tiles_per_part, rows, has_ragged),
        out_shape=jax.ShapeDtypeStruct((8, lane * parts), jnp.float32),
        grid_spec=pltpu.PrefetchScalarGridSpec(
            num_scalar_prefetch=0,
            grid=(parts, tiles_per_part),
            in_specs=[
                pl.BlockSpec((r_tile, lane), in_map),
                pl.BlockSpec((r_tile, lane), in_map),
            ],
            out_specs=pl.BlockSpec((8, lane), lambda p, t: (0, p)),
            scratch_shapes=[pltpu.VMEM((8, lane), jnp.float32)],
        ),
        compiler_params=pltpu.CompilerParams(
            dimension_semantics=("parallel", "arbitrary"),
            vmem_limit_bytes=32 * 1024 * 1024,
        ),
        cost_estimate=cost,
    )(mu2, lv2)

    # Single tiny cross-lane reduce of the per-part (8, lane) partials.
    total = jnp.sum(out, dtype=jnp.float32)
    return -0.5 * total / jnp.float32(count)   # divide by the TRUE count


if __name__ == "__main__":
    key = jax.random.PRNGKey(0)
    k1, k2, k3, k4, k5, k6 = jax.random.split(key, 6)

    # 1) Tiny VAE latent (batch=2, hidden=32): pure-JAX fast path.
    mu_s = jax.random.normal(k1, (2, 32), jnp.float32)
    lv_s = 0.1 * jax.random.normal(k2, (2, 32), jnp.float32)
    got_s = kl_div(mu_s, lv_s)
    jax.block_until_ready(got_s)
    ref_s = _kl_ref(mu_s, lv_s)
    assert jnp.allclose(got_s, ref_s, rtol=1e-5, atol=1e-6), (got_s, ref_s)

    # 2) Small latent block (batch=4, seq=64, hidden=256): Pallas path, the
    #    trailing dim is used directly as the lane (no pad, free reshape).
    mu_m = jax.random.normal(k3, (4, 64, 256), jnp.float32)
    lv_m = 0.2 * jax.random.normal(k4, (4, 64, 256), jnp.float32)
    got_m = kl_div(mu_m, lv_m)
    jax.block_until_ready(got_m)
    ref_m = _kl_ref(mu_m, lv_m)
    assert jnp.allclose(got_m, ref_m, rtol=1e-4, atol=1e-5), (got_m, ref_m)

    # 3) bf16, multi-tile + ragged last tile: small forced tile exercises the
    #    in-kernel tail mask and multi-tile f32 accumulation.
    mu_b = jax.random.normal(k5, (4, 100, 128), jnp.float32).astype(jnp.bfloat16)
    lv_b = (0.2 * jax.random.normal(k6, (4, 100, 128), jnp.float32)
            ).astype(jnp.bfloat16)
    got_b = kl_div(mu_b, lv_b, target_tile_elems=128 * 128)
    jax.block_until_ready(got_b)
    ref_b = _kl_ref(mu_b, lv_b)
    assert jnp.allclose(got_b, ref_b, rtol=2e-3, atol=2e-4), (got_b, ref_b)

    print("KERNEL_OK")
</pallas_src>

<mosaic_0001>
module attributes {stable_mosaic.version = 11 : i64} {
  func.func @kernel(%arg0: i32, %arg1: i32, %arg2: memref<256x256xf32, #tpu.memory_space<vmem>>, %arg3: memref<256x256xf32, #tpu.memory_space<vmem>>, %arg4: memref<8x256xf32, #tpu.memory_space<vmem>>, %arg5: memref<8x256xf32, #tpu.memory_space<vmem>>) attributes {dimension_semantics = [#tpu.dimension_semantics<parallel>, #tpu.dimension_semantics<arbitrary>], iteration_bounds = array<i64: 1, 1>, scalar_prefetch = 0 : i64, scratch_operands = 1 : i64, tpu.core_type = #tpu.core_type<tc>, window_params = [{transform_indices = @transform_0, window_bounds = array<i64: 256, 256>}, {transform_indices = @transform_1, window_bounds = array<i64: 256, 256>}, {transform_indices = @transform_2, window_bounds = array<i64: 8, 256>}]} {
    %c0_i32 = arith.constant 0 : i32
    %0 = arith.cmpi eq, %arg1, %c0_i32 : i32
    %1 = arith.extui %0 : i1 to i32
    %c0_i32_0 = arith.constant 0 : i32
    %2 = arith.cmpi ne, %1, %c0_i32_0 : i32
    scf.if %2 {
      %cst_11 = arith.constant 0.000000e+00 : f32
      %19 = vector.broadcast %cst_11 : f32 to vector<8x256xf32>
      %c0_12 = arith.constant 0 : index
      %c0_13 = arith.constant 0 : index
      %20 = vector.load %arg5[%c0_12, %c0_13] : memref<8x256xf32, #tpu.memory_space<vmem>>, vector<8x256xf32>
      tpu.vector_store %arg5[%c0_12, %c0_13], %19 {strides = array<i32>} : memref<8x256xf32, #tpu.memory_space<vmem>>, vector<8x256xf32>,
    } else {
    }
    %c0 = arith.constant 0 : index
    %c0_1 = arith.constant 0 : index
    %3 = vector.load %arg2[%c0, %c0_1] : memref<256x256xf32, #tpu.memory_space<vmem>>, vector<256x256xf32>
    %c0_2 = arith.constant 0 : index
    %c0_3 = arith.constant 0 : index
    %4 = vector.load %arg3[%c0_2, %c0_3] : memref<256x256xf32, #tpu.memory_space<vmem>>, vector<256x256xf32>
    %cst = arith.constant 1.000000e+00 : f32
    %5 = vector.broadcast %cst : f32 to vector<256x256xf32>
    %6 = arith.addf %5, %4 : vector<256x256xf32>
    %7 = arith.mulf %3, %3 : vector<256x256xf32>
    %8 = arith.subf %6, %7 : vector<256x256xf32>
    %9 = math.exp %4 : vector<256x256xf32>
    %10 = arith.subf %8, %9 : vector<256x256xf32>
    %c0_4 = arith.constant 0 : index
    %c0_5 = arith.constant 0 : index
    %11 = vector.load %arg5[%c0_4, %c0_5] : memref<8x256xf32, #tpu.memory_space<vmem>>, vector<8x256xf32>
    %12 = vector.shape_cast %10 : vector<256x256xf32> to vector<32x8x256xf32>
    %cst_6 = arith.constant dense<0.000000e+00> : vector<8x256xf32>
    %13 = vector.multi_reduction <add>, %12, %cst_6 [0] : vector<32x8x256xf32> to vector<8x256xf32>
    %14 = arith.addf %11, %13 : vector<8x256xf32>
    %c0_7 = arith.constant 0 : index
    %c0_8 = arith.constant 0 : index
    %15 = vector.load %arg5[%c0_7, %c0_8] : memref<8x256xf32, #tpu.memory_space<vmem>>, vector<8x256xf32>
    tpu.vector_store %arg5[%c0_7, %c0_8], %14 {strides = array<i32>} : memref<8x256xf32, #tpu.memory_space<vmem>>, vector<8x256xf32>,
    %c0_i32_9 = arith.constant 0 : i32
    %16 = arith.cmpi eq, %arg1, %c0_i32_9 : i32
    %17 = arith.extui %16 : i1 to i32
    %c0_i32_10 = arith.constant 0 : i32
    %18 = arith.cmpi ne, %17, %c0_i32_10 : i32
    scf.if %18 {
      %c0_11 = arith.constant 0 : index
      %c0_12 = arith.constant 0 : index
      %19 = vector.load %arg5[%c0_11, %c0_12] : memref<8x256xf32, #tpu.memory_space<vmem>>, vector<8x256xf32>
      %c0_13 = arith.constant 0 : index
      %c0_14 = arith.constant 0 : index
      %20 = vector.load %arg4[%c0_13, %c0_14] : memref<8x256xf32, #tpu.memory_space<vmem>>, vector<8x256xf32>
      tpu.vector_store %arg4[%c0_13, %c0_14], %19 {strides = array<i32>} : memref<8x256xf32, #tpu.memory_space<vmem>>, vector<8x256xf32>,
    } else {
    }
    return
  }
  func.func @transform_0(%arg0: i32, %arg1: i32) -> (i32, i32) {
    %c1_i32 = arith.constant 1 : i32
    %0 = arith.muli %arg0, %c1_i32 : i32
    %1 = arith.addi %0, %arg1 : i32
    %c0_i32 = arith.constant 0 : i32
    %2 = arith.minsi %1, %c0_i32 : i32
    %c0_i32_0 = arith.constant 0 : i32
    %c0_i32_1 = arith.constant 0 : i32
    return %2, %c0_i32_0 : i32, i32
  }
  func.func @transform_1(%arg0: i32, %arg1: i32) -> (i32, i32) {
    %c1_i32 = arith.constant 1 : i32
    %0 = arith.muli %arg0, %c1_i32 : i32
    %1 = arith.addi %0, %arg1 : i32
    %c0_i32 = arith.constant 0 : i32
    %2 = arith.minsi %1, %c0_i32 : i32
    %c0_i32_0 = arith.constant 0 : i32
    %c0_i32_1 = arith.constant 0 : i32
    return %2, %c0_i32_0 : i32, i32
  }
  func.func @transform_2(%arg0: i32, %arg1: i32) -> (i32, i32) {
    %c0_i32 = arith.constant 0 : i32
    %c0_i32_0 = arith.constant 0 : i32
    return %c0_i32, %arg0 : i32, i32
  }
}

</mosaic_0001>

<bundles_post_ra>
// kernel: tpu_custom_call.1
= control target key start
LH: loop header
LB: loop body
LE: loop exit
PB: predicated region body
PF: predicated region fallthrough
CT: control target
= control target key end

     0   :  { %7 = vsyncpa [#allocation4], 0  ;;  %s1663_s0 = inlined_call_operand.hbm [shape: f32[256,256], index: 0, kind: input, shape index: {}]   ;;  %s1664_s1 = inlined_call_operand.hbm [shape: f32[256,256], index: 1, kind: input, shape index: {}]   ;;  %s1665_s2 = inlined_call_operand.hbm [shape: f32[8,256], index: 2, kind: output, shape index: {}]  }
   0x1   :  { %8 = vsyncpa [#allocation7], 0 }
   0x2   :  { %9 = vsyncpa [#allocation5], 0  ;;  %s874_s9 = smov [#allocation3]  }
   0x3   :  { %s22_s10 = sshll.u32 %s874_s9, 4  ;;  %s23_s10 = int_to_ptr.vmem [resolvable:$true] %s22_s10 }
   0x4   :  { %s816_s11 = scalar_lea.vmem %s23_s10, 8192  ;;  %p821_p1 = scmp.lt.s32.totalorder %s23_s10, %s23_s10 }
   0x5   :  { %p817_p0 = scmp.ne.s32.totalorder %s23_s10, %s816_s11  ;;  %p822_p2 = scmp.lt.s32.totalorder %s816_s11, %s816_s11 }
   0x7   :  { %p823_p3 = por %p822_p2, %p821_p1 }
   0x9   :  { %p824_p4 = pnand %p823_p3, %p817_p0 }
   0xb   :  { %827 = shalt.err (!%p824_p4)
}
   0xc   :  { %s875_s12 = smov 256   ;;  %s876_s13 = smov 16  }
   0xd   :  { %28 = dma.hbm_to_vmem [thread:$0]  %s1663_s0, 8192, %s23_s10, [#allocation4], %s875_s12, %s875_s12, %s876_s13  }
   0xe   :  { %s877_s16 = smov [#allocation6]  }
   0xf   :  { %s41_s17 = sshll.u32 %s877_s16, 4  ;;  %s42_s17 = int_to_ptr.vmem [resolvable:$true] %s41_s17 }
  0x10   :  { %s836_s18 = scalar_lea.vmem %s42_s17, 8192  ;;  %p841_p6 = scmp.lt.s32.totalorder %s42_s17, %s42_s17 }
  0x11   :  { %p837_p5 = scmp.ne.s32.totalorder %s42_s17, %s836_s18  ;;  %p842_p7 = scmp.lt.s32.totalorder %s836_s18, %s836_s18 }
  0x13   :  { %p843_p8 = por %p842_p7, %p841_p6 }
  0x15   :  { %p844_p9 = pnand %p843_p8, %p837_p5 }
  0x17   :  { %847 = shalt.err (!%p844_p9)
}
  0x18   :  { %47 = dma.hbm_to_vmem [thread:$0]  %s1664_s1, 8192, %s42_s17, [#allocation7], %s875_s12, %s875_s12, %s876_s13  }
  0x19   :  { %868 = dma.done.wait [#allocation4], 8192  }
  0x1a   :  { %869 = vsyncadd [#allocation4], 4294959104 }
  0x1b   :  { %870 = dma.done.wait [#allocation7], 8192  }
  0x1c   :  { %871 = vsyncadd [#allocation7], 4294959104  ;;  %v68_v0 = vld [vmem:[#allocation3] sm:$0xff]  ;;  %v69_v1 = vld [vmem:[#allocation3 + $0x8] sm:$0xff]  ;;  %s878_s0 = smov [#allocation8]  }
  0x1d   :  { %v70_v2 = vld [vmem:[#allocation3 + $0x10] sm:$0xff]  ;;  %v71_v3 = vld [vmem:[#allocation3 + $0x18] sm:$0xff]  ;;  %v72_v4 = vld [vmem:[#allocation3 + $0x20] sm:$0xff]  ;;  %v900_v22 = vmul.f32 %v68_v0, %v68_v0  ;;  %v902_v23 = vmul.f32 %v69_v1, %v69_v1  ;;  %s661_s1 = sshll.u32 %s878_s0, 4  ;;  %s662_s1 = int_to_ptr.vmem [resolvable:$true] %s661_s1 }
  0x1e   :  { %v73_v5 = vld [vmem:[#allocation3 + $0x28] sm:$0xff]  ;;  %v74_v6 = vld [vmem:[#allocation3 + $0x30] sm:$0xff]  ;;  %v75_v7 = vld [vmem:[#allocation3 + $0x38] sm:$0xff]  ;;  %v904_v28 = vmul.f32 %v70_v2, %v70_v2  ;;  %v906_v29 = vmul.f32 %v71_v3, %v71_v3  ;;  %v908_v30 = vmul.f32 %v72_v4, %v72_v4  ;;  %s848_s21 = scalar_lea.vmem %s662_s1, 256  ;;  %p853_p11 = scmp.lt.s32.totalorder %s662_s1, %s662_s1 }
  0x1f   :  { %v76_v8 = vld [vmem:[#allocation3 + $0x40] sm:$0xff]  ;;  %v77_v9 = vld [vmem:[#allocation3 + $0x48] sm:$0xff]  ;;  %v78_v10 = vld [vmem:[#allocation3 + $0x50] sm:$0xff]  ;;  %1781 = vst [vmem:[#allocation12_spill] sm:$0xff] %v900_v22  ;;  %v910_v31 = vmul.f32 %v73_v5, %v73_v5  ;;  %v912_v36 = vmul.f32 %v74_v6, %v74_v6  ;;  %v914_v37 = vmul.f32 %v75_v7, %v75_v7  ;;  %p849_p10 = scmp.ne.s32.totalorder %s662_s1, %s848_s21  ;;  %p854_p12 = scmp.lt.s32.totalorder %s848_s21, %s848_s21 }
  0x20   :  { %v79_v11 = vld [vmem:[#allocation3 + $0x58] sm:$0xff]  ;;  %v80_v12 = vld [vmem:[#allocation3 + $0x60] sm:$0xff]  ;;  %v81_v13 = vld [vmem:[#allocation3 + $0x68] sm:$0xff]  ;;  %1782 = vst [vmem:[#allocation13_spill] sm:$0xff] %v902_v23  ;;  %v916_v38 = vmul.f32 %v76_v8, %v76_v8  ;;  %v918_v39 = vmul.f32 %v77_v9, %v77_v9  ;;  %v920_v44 = vmul.f32 %v78_v10, %v78_v10 }
  0x21   :  { %v82_v14 = vld [vmem:[#allocation3 + $0x70] sm:$0xff]  ;;  %v83_v15 = vld [vmem:[#allocation3 + $0x78] sm:$0xff]  ;;  %v84_v16 = vld [vmem:[#allocation3 + $0x80] sm:$0xff]  ;;  %1783 = vst [vmem:[#allocation14_spill] sm:$0xff] %v904_v28  ;;  %v922_v45 = vmul.f32 %v79_v11, %v79_v11  ;;  %v924_v46 = vmul.f32 %v80_v12, %v80_v12  ;;  %v926_v47 = vmul.f32 %v81_v13, %v81_v13  ;;  %p855_p13 = por %p854_p12, %p853_p11 }
  0x22   :  { %v85_v17 = vld [vmem:[#allocation3 + $0x88] sm:$0xff]  ;;  %v86_v18 = vld [vmem:[#allocation3 + $0x90] sm:$0xff]  ;;  %v87_v19 = vld [vmem:[#allocation3 + $0x98] sm:$0xff]  ;;  %1784 = vst [vmem:[#allocation15_spill] sm:$0xff] %v906_v29  ;;  %v928_v51 = vmul.f32 %v82_v14, %v82_v14  ;;  %v930_v52 = vmul.f32 %v83_v15, %v83_v15  ;;  %v932_v53 = vmul.f32 %v84_v16, %v84_v16 }
  0x23   :  { %v88_v20 = vld [vmem:[#allocation3 + $0xa0] sm:$0xff]  ;;  %v89_v21 = vld [vmem:[#allocation3 + $0xa8] sm:$0xff]  ;;  %v90_v24 = vld [vmem:[#allocation3 + $0xb0] sm:$0xff]  ;;  %1785 = vst [vmem:[#allocation16_spill] sm:$0xff] %v908_v30  ;;  %v934_v54 = vmul.f32 %v85_v17, %v85_v17  ;;  %v936_v58 = vmul.f32 %v86_v18, %v86_v18  ;;  %v938_v59 = vmul.f32 %v87_v19, %v87_v19  ;;  %p856_p0 = pnand %p855_p13, %p849_p10 }
  0x24   :  { %v91_v25 = vld [vmem:[#allocation3 + $0xb8] sm:$0xff]  ;;  %v92_v26 = vld [vmem:[#allocation3 + $0xc0] sm:$0xff]  ;;  %v93_v27 = vld [vmem:[#allocation3 + $0xc8] sm:$0xff]  ;;  %1786 = vst [vmem:[#allocation17_spill] sm:$0xff] %v910_v31  ;;  %v940_v60 = vmul.f32 %v88_v20, %v88_v20  ;;  %v942_v61 = vmul.f32 %v89_v21, %v89_v21  ;;  %v944_v1 = vmul.f32 %v90_v24, %v90_v24 }
  0x25   :  { %v94_v32 = vld [vmem:[#allocation3 + $0xd0] sm:$0xff]  ;;  %v95_v33 = vld [vmem:[#allocation3 + $0xd8] sm:$0xff]  ;;  %v96_v34 = vld [vmem:[#allocation3 + $0xe0] sm:$0xff]  ;;  %1787 = vst [vmem:[#allocation18_spill] sm:$0xff] %v912_v36  ;;  %v946_v2 = vmul.f32 %v91_v25, %v91_v25  ;;  %v948_v3 = vmul.f32 %v92_v26, %v92_v26  ;;  %v950_v4 = vmul.f32 %v93_v27, %v93_v27 }
  0x26   :  { %v97_v35 = vld [vmem:[#allocation3 + $0xe8] sm:$0xff]  ;;  %1788 = vst [vmem:[#allocation19_spill] sm:$0xff] %v914_v37  ;;  %1789 = vst [vmem:[#allocation20_spill] sm:$0xff] %v916_v38  ;;  %v98_v40 = vld [vmem:[#allocation3 + $0xf0] sm:$0xff]  ;;  %v952_v8 = vmul.f32 %v94_v32, %v94_v32  ;;  %v954_v9 = vmul.f32 %v95_v33, %v95_v33  ;;  %v956_v10 = vmul.f32 %v96_v34, %v96_v34 }
  0x27   :  { %1790 = vst [vmem:[#allocation21_spill] sm:$0xff] %v918_v39  ;;  %v99_v41 = vld [vmem:[#allocation3 + $0xf8] sm:$0xff]  ;;  %v100_v42 = vld [vmem:[#allocation3 + $0x100] sm:$0xff]  ;;  %v101_v43 = vld [vmem:[#allocation3 + $0x108] sm:$0xff]  ;;  %v958_v11 = vmul.f32 %v97_v35, %v97_v35  ;;  %v960_v15 = vmul.f32 %v98_v40, %v98_v40 }
  0x28   :  { %1791 = vst [vmem:[#allocation22_spill] sm:$0xff] %v920_v44  ;;  %1792 = vst [vmem:[#allocation23_spill] sm:$0xff] %v922_v45  ;;  %v102_v48 = vld [vmem:[#allocation3 + $0x110] sm:$0xff]  ;;  %v103_v49 = vld [vmem:[#allocation3 + $0x118] sm:$0xff]  ;;  %v962_v16 = vmul.f32 %v99_v41, %v99_v41  ;;  %v964_v17 = vmul.f32 %v100_v42, %v100_v42  ;;  %v966_v18 = vmul.f32 %v101_v43, %v101_v43 }
  0x29   :  { %1793 = vst [vmem:[#allocation24_spill] sm:$0xff] %v924_v46  ;;  %1794 = vst [vmem:[#allocation25_spill] sm:$0xff] %v926_v47  ;;  %v104_v50 = vld [vmem:[#allocation3 + $0x120] sm:$0xff]  ;;  %v105_v55 = vld [vmem:[#allocation3 + $0x128] sm:$0xff]  ;;  %v968_v24 = vmul.f32 %v102_v48, %v102_v48  ;;  %v970_v25 = vmul.f32 %v103_v49, %v103_v49 }
  0x2a   :  { %v106_v56 = vld [vmem:[#allocation3 + $0x130] sm:$0xff]  ;;  %v107_v57 = vld [vmem:[#allocation3 + $0x138] sm:$0xff]  ;;  %v108_v62 = vld [vmem:[#allocation3 + $0x140] sm:$0xff]  ;;  %1795 = vst [vmem:[#allocation26_spill] sm:$0xff] %v952_v8  ;;  %v972_v26 = vmul.f32 %v104_v50, %v104_v50  ;;  %v974_v27 = vmul.f32 %v105_v55, %v105_v55 }
  0x2b   :  { %v109_v63 = vld [vmem:[#allocation3 + $0x148] sm:$0xff]  ;;  %v110_v0 = vld [vmem:[#allocation3 + $0x150] sm:$0xff]  ;;  %v111_v5 = vld [vmem:[#allocation3 + $0x158] sm:$0xff]  ;;  %1796 = vst [vmem:[#allocation27_spill] sm:$0xff] %v954_v9  ;;  %v976_v35 = vmul.f32 %v106_v56, %v106_v56  ;;  %v978_v40 = vmul.f32 %v107_v57, %v107_v57  ;;  %v980_v41 = vmul.f32 %v108_v62, %v108_v62 }
  0x2c   :  { %v112_v6 = vld [vmem:[#allocation3 + $0x160] sm:$0xff]  ;;  %v113_v7 = vld [vmem:[#allocation3 + $0x168] sm:$0xff]  ;;  %1797 = vst [vmem:[#allocation28_spill] sm:$0xff] %v956_v10  ;;  %1798 = vst [vmem:[#allocation29_spill] sm:$0xff] %v958_v11  ;;  %v982_v42 = vmul.f32 %v109_v63, %v109_v63  ;;  %v984_v49 = vmul.f32 %v110_v0, %v110_v0  ;;  %v986_v50 = vmul.f32 %v111_v5, %v111_v5 }
  0x2d   :  { %v114_v12 = vld [vmem:[#allocation3 + $0x170] sm:$0xff]  ;;  %v115_v13 = vld [vmem:[#allocation3 + $0x178] sm:$0xff]  ;;  %v116_v14 = vld [vmem:[#allocation3 + $0x180] sm:$0xff]  ;;  %1799 = vst [vmem:[#allocation30_spill] sm:$0xff] %v960_v15  ;;  %v988_v55 = vmul.f32 %v112_v6, %v112_v6 }
  0x2e   :  { %1800 = vst [vmem:[#allocation31_spill] sm:$0xff] %v962_v16  ;;  %1801 = vst [vmem:[#allocation32_spill] sm:$0xff] %v964_v17  ;;  %v117_v19 = vld [vmem:[#allocation3 + $0x188] sm:$0xff]  ;;  %v118_v20 = vld [vmem:[#allocation3 + $0x190] sm:$0xff]  ;;  %v992_v57 = vmul.f32 %v114_v12, %v114_v12  ;;  %v994_v62 = vmul.f32 %v115_v13, %v115_v13  ;;  %v996_v63 = vmul.f32 %v116_v14, %v116_v14 }
  0x2f   :  { %1802 = vst [vmem:[#allocation33_spill] sm:$0xff] %v966_v18  ;;  %v119_v21 = vld [vmem:[#allocation3 + $0x198] sm:$0xff]  ;;  %1803 = vst [vmem:[#allocation34_spill] sm:$0xff] %v968_v24  ;;  %v120_v32 = vld [vmem:[#allocation3 + $0x1a0] sm:$0xff]  ;;  %v1002_v5 = vmul.f32 %v118_v20, %v118_v20 }
  0x30   :  { %1804 = vst [vmem:[#allocation35_spill] sm:$0xff] %v970_v25  ;;  %1805 = vst [vmem:[#allocation36_spill] sm:$0xff] %v972_v26  ;;  %v121_v33 = vld [vmem:[#allocation3 + $0x1a8] sm:$0xff]  ;;  %v122_v34 = vld [vmem:[#allocation3 + $0x1b0] sm:$0xff]  ;;  %v1004_v6 = vmul.f32 %v119_v21, %v119_v21 }
  0x31   :  { %1806 = vst [vmem:[#allocation37_spill] sm:$0xff] %v974_v27  ;;  %1807 = vst [vmem:[#allocation38_spill] sm:$0xff] %v976_v35  ;;  %v123_v43 = vld [vmem:[#allocation3 + $0x1b8] sm:$0xff]  ;;  %v124_v48 = vld [vmem:[#allocation3 + $0x1c0] sm:$0xff]  ;;  %v990_v27 = vmul.f32 %v113_v7, %v113_v7  ;;  %v1006_v7 = vmul.f32 %v120_v32, %v120_v32  ;;  %v1015_v14 = vmul.f32 %v122_v34, %v122_v34 }
  0x32   :  { %1808 = vst [vmem:[#allocation39_spill] sm:$0xff] %v978_v40  ;;  %1809 = vst [vmem:[#allocation40_spill] sm:$0xff] %v980_v41  ;;  %v125_v24 = vld [vmem:[#allocation3 + $0x1c8] sm:$0xff]  ;;  %v126_v26 = vld [vmem:[#allocation3 + $0x1d0] sm:$0xff] }
  0x33   :  { %1810 = vst [vmem:[#allocation41_spill] sm:$0xff] %v982_v42  ;;  %1811 = vst [vmem:[#allocation42_spill] sm:$0xff] %v984_v49  ;;  %v127_v56 = vld [vmem:[#allocation3 + $0x1d8] sm:$0xff]  ;;  %v128_v35 = vld [vmem:[#allocation3 + $0x1e0] sm:$0xff]  ;;  %v998_v42 = vmul.f32 %v117_v19, %v117_v19  ;;  %v1017_v19 = vmul.f32 %v123_v43, %v123_v43 }
  0x34   :  { %1812 = vst [vmem:[#allocation43_spill] sm:$0xff] %v986_v50  ;;  %1813 = vst [vmem:[#allocation44_spill] sm:$0xff] %v988_v55  ;;  %v129_v41 = vld [vmem:[#allocation3 + $0x1e8] sm:$0xff]  ;;  %v130_v0 = vld [vmem:[#allocation3 + $0x1f0] sm:$0xff] }
  0x35   :  { %1814 = vst [vmem:[#allocation45_spill] sm:$0xff] %v990_v27  ;;  %1815 = vst [vmem:[#allocation46_spill] sm:$0xff] %v992_v57  ;;  %v1000_v49 = vld [vmem:[#allocation6] sm:$0xff]  ;;  %v1008_v27 = vmul.f32 %v121_v33, %v121_v33  ;;  %v131_v12 = vld [vmem:[#allocation3 + $0x1f8] sm:$0xff]  ;;  %v1028_v33 = vmul.f32 %v125_v24, %v125_v24 }
  0x36   :  { %1816 = vst [vmem:[#allocation47_spill] sm:$0xff] %v994_v62  ;;  %1817 = vst [vmem:[#allocation48_spill] sm:$0xff] %v996_v63  ;;  %v1010_v57 = vld [vmem:[#allocation6 + $0x8] sm:$0xff]  ;;  %v1013_v13 = vadd.f32 1.0, %v1000_v49  ;;  %v1021_v20 = vld [vmem:[#allocation6 + $0x10] sm:$0xff] }
  0x37   :  { %1818 = vst [vmem:[#allocation49_spill] sm:$0xff] %v998_v42  ;;  %1819 = vst [vmem:[#allocation50_spill] sm:$0xff] %v1002_v5  ;;  %v1019_v42 = vmul.f32 %v124_v48, %v124_v48  ;;  %v1023_v21 = vld [vmem:[#allocation6 + $0x18] sm:$0xff]  ;;  %v1026_v32 = vadd.f32 1.0, %v1010_v57  ;;  %v1036_v34 = vld [vmem:[#allocation6 + $0x28] sm:$0xff]  ;;  %v1041_v48 = vadd.f32 1.0, %v1021_v20 }
  0x38   :  { %1820 = vst [vmem:[#allocation51_spill] sm:$0xff] %v1004_v6  ;;  %1821 = vst [vmem:[#allocation52_spill] sm:$0xff] %v1006_v7  ;;  %v1032_v7 = vmul.f32 %v127_v56, %v127_v56  ;;  %v1034_v6 = vld [vmem:[#allocation6 + $0x20] sm:$0xff]  ;;  %v1038_v43 = vld [vmem:[#allocation6 + $0x30] sm:$0xff]  ;;  %v394_v47 = vmul.f32 1.442695, %v1023_v21 }
  0x39   :  { %1822 = vst [vmem:[#allocation53_spill] sm:$0xff] %v1008_v27  ;;  %1823 = vst [vmem:[#allocation54_spill] sm:$0xff] %v1013_v13  ;;  %v1030_v27 = vmul.f32 %v126_v26, %v126_v26  ;;  %v1049_v24 = vld [vmem:[#allocation6 + $0x38] sm:$0xff]  ;;  %v1051_v26 = vld [vmem:[#allocation6 + $0x40] sm:$0xff] }
  0x3a   :  { %1824 = vst [vmem:[#allocation55_spill] sm:$0xff] %v1015_v14  ;;  %1825 = vst [vmem:[#allocation56_spill] sm:$0xff] %v1017_v19  ;;  %v1045_v19 = vmul.f32 %v129_v41, %v129_v41  ;;  %v1047_v14 = vmul.f32 %v130_v0, %v130_v0  ;;  %v1053_v56 = vld [vmem:[#allocation6 + $0x48] sm:$0xff]  ;;  %v1066_v41 = vld [vmem:[#allocation6 + $0x50] sm:$0xff]  ;;  %v1079_v5 = vadd.f32 1.0, %v1051_v26 }
  0x3b   :  { %1826 = vst [vmem:[#allocation57_spill] sm:$0xff] %v1019_v42  ;;  %1827 = vst [vmem:[#allocation58_spill] sm:$0xff] %v1026_v32  ;;  %v1043_v42 = vmul.f32 %v128_v35, %v128_v35  ;;  %v1064_v35 = vmul.f32 %v131_v12, %v131_v12  ;;  %v1068_v0 = vld [vmem:[#allocation6 + $0x58] sm:$0xff]  ;;  %v1083_v12 = vld [vmem:[#allocation6 + $0x68] sm:$0xff]  ;;  %v1090_v55 = vadd.f32 1.0, %v1053_v56  ;;  %v1093_v50 = vadd.f32 1.0, %v1066_v41 }
  0x3c   :  { %1828 = vst [vmem:[#allocation59_spill] sm:$0xff] %v1028_v33  ;;  %1829 = vst [vmem:[#allocation60_spill] sm:$0xff] %v1030_v27  ;;  %v1059_v27 = vadd.f32 1.0, %v1034_v6  ;;  %v1062_v33 = vadd.f32 1.0, %v1036_v34  ;;  %v1087_v62 = vld [vmem:[#allocation6 + $0x78] sm:$0xff]  ;;  %v1096_v40 = vadd.f32 1.0, %v1068_v0 }
  0x3d   :  { %1830 = vst [vmem:[#allocation61_spill] sm:$0xff] %v1032_v7  ;;  %1831 = vst [vmem:[#allocation62_spill] sm:$0xff] %v1041_v48  ;;  %v1056_v7 = vadd.f32 1.0, %v1023_v21  ;;  %v1100_v18 = vld [vmem:[#allocation6 + $0x80] sm:$0xff]  ;;  %v1102_v63 = vld [vmem:[#allocation6 + $0x88] sm:$0xff]  ;;  %v1110_v17 = vadd.f32 1.0, %v1083_v12 }
  0x3e   :  { %1832 = vst [vmem:[#allocation63_spill] sm:$0xff] %v1043_v42  ;;  %1833 = vst [vmem:[#allocation64_spill] sm:$0xff] %v1045_v19  ;;  %v1073_v19 = vadd.f32 1.0, %v1038_v43  ;;  %v1076_v42 = vadd.f32 1.0, %v1049_v24  ;;  %v1104_v22 = vld [vmem:[#allocation6 + $0x90] sm:$0xff]  ;;  %v1117_v11 = vld [vmem:[#allocation6 + $0x98] sm:$0xff] }
  0x3f   :  { %1834 = vst [vmem:[#allocation65_spill] sm:$0xff] %v1047_v14  ;;  %1835 = vst [vmem:[#allocation66_spill] sm:$0xff] %v1056_v7  ;;  %v1070_v14 = vld [vmem:[#allocation6 + $0x60] sm:$0xff]  ;;  %v1121_v23 = vld [vmem:[#allocation6 + $0xa8] sm:$0xff]  ;;  %v1124_v32 = vadd.f32 1.0, %v1087_v62  ;;  %v1127_v10 = vadd.f32 1.0, %v1100_v18 }
  0x40   :  { %1836 = vst [vmem:[#allocation67_spill] sm:$0xff] %v1059_v27  ;;  %1837 = vst [vmem:[#allocation68_spill] sm:$0xff] %v1062_v33  ;;  %v1107_v13 = vadd.f32 1.0, %v1070_v14  ;;  %v1119_v25 = vld [vmem:[#allocation6 + $0xa0] sm:$0xff]  ;;  %v1136_v15 = vld [vmem:[#allocation6 + $0xb8] sm:$0xff]  ;;  %v1141_v48 = vadd.f32 1.0, %v1104_v22 }
  0x41   :  { %1838 = vst [vmem:[#allocation69_spill] sm:$0xff] %v1064_v35  ;;  %1839 = vst [vmem:[#allocation70_spill] sm:$0xff] %v1068_v0  ;;  %v1085_v35 = vld [vmem:[#allocation6 + $0x70] sm:$0xff]  ;;  %v1138_v28 = vld [vmem:[#allocation6 + $0xc0] sm:$0xff]  ;;  %v1158_v7 = vadd.f32 1.0, %v1121_v23 }
  0x42   :  { %1840 = vst [vmem:[#allocation71_spill] sm:$0xff] %v1070_v14  ;;  %1841 = vst [vmem:[#allocation72_spill] sm:$0xff] %v1073_v19  ;;  %v1113_v16 = vadd.f32 1.0, %v1085_v35  ;;  %v1134_v14 = vld [vmem:[#allocation6 + $0xb0] sm:$0xff]  ;;  %v1151_v9 = vld [vmem:[#allocation6 + $0xc8] sm:$0xff]  ;;  %v1175_v27 = vadd.f32 1.0, %v1138_v28 }
  0x43   :  { %1842 = vst [vmem:[#allocation73_spill] sm:$0xff] %v1076_v42  ;;  %1843 = vst [vmem:[#allocation74_spill] sm:$0xff] %v1079_v5  ;;  %v1155_v29 = vld [vmem:[#allocation6 + $0xd8] sm:$0xff]  ;;  %v1168_v8 = vld [vmem:[#allocation6 + $0xe0] sm:$0xff]  ;;  %v398_v21 = vmul.f32 1.442695, %v1036_v34 }
  0x44   :  { %1844 = vst [vmem:[#allocation75_spill] sm:$0xff] %v1083_v12  ;;  %1845 = vst [vmem:[#allocation76_spill] sm:$0xff] %v1085_v35  ;;  %v1130_v12 = vadd.f32 1.0, %v1102_v63  ;;  %v1153_v35 = vld [vmem:[#allocation6 + $0xd0] sm:$0xff]  ;;  %v1185_v0 = vld [vmem:[#allocation6 + $0xf8] sm:$0xff]  ;;  %v1192_v33 = vadd.f32 1.0, %v1155_v29 }
  0x45   :  { %1846 = vst [vmem:[#allocation77_spill] sm:$0xff] %v1087_v62  ;;  %1847 = vst [vmem:[#allocation78_spill] sm:$0xff] %v1090_v55  ;;  %v1144_v62 = vadd.f32 1.0, %v1117_v11  ;;  %v1172_v30 = vld [vmem:[#allocation6 + $0xf0] sm:$0xff]  ;;  %v1189_v31 = vld [vmem:[#allocation6 + $0x108] sm:$0xff] }
  0x46   :  { %1848 = vst [vmem:[#allocation79_spill] sm:$0xff] %v1093_v50  ;;  %1849 = vst [vmem:[#allocation80_spill] sm:$0xff] %v1096_v40  ;;  %v1206_v36 = vld [vmem:[#allocation6 + $0x120] sm:$0xff]  ;;  %v1209_v19 = vadd.f32 1.0, %v1172_v30  ;;  %v1223_v37 = vld [vmem:[#allocation6 + $0x138] sm:$0xff]  ;;  %v1226_v42 = vadd.f32 1.0, %v1189_v31 }
  0x47   :  { %1850 = vst [vmem:[#allocation81_spill] sm:$0xff] %v1100_v18  ;;  %1851 = vst [vmem:[#allocation82_spill] sm:$0xff] %v1102_v63  ;;  %v1147_v18 = vadd.f32 1.0, %v1119_v25  ;;  %v1170_v63 = vld [vmem:[#allocation6 + $0xe8] sm:$0xff]  ;;  %v1240_v38 = vld [vmem:[#allocation6 + $0x150] sm:$0xff]  ;;  %v1243_v5 = vadd.f32 1.0, %v1206_v36 }
  0x48   :  { %1852 = vst [vmem:[#allocation83_spill] sm:$0xff] %v1104_v22  ;;  %1853 = vst [vmem:[#allocation84_spill] sm:$0xff] %v1107_v13  ;;  %v1161_v22 = vadd.f32 1.0, %v1134_v14  ;;  %v1257_v39 = vld [vmem:[#allocation6 + $0x168] sm:$0xff]  ;;  %v1260_v55 = vadd.f32 1.0, %v1223_v37  ;;  %v1274_v44 = vld [vmem:[#allocation6 + $0x180] sm:$0xff] }
  0x49   :  { %1854 = vst [vmem:[#allocation85_spill] sm:$0xff] %v1110_v17  ;;  %1855 = vst [vmem:[#allocation86_spill] sm:$0xff] %v1117_v11  ;;  %v1164_v11 = vadd.f32 1.0, %v1136_v15  ;;  %v1277_v50 = vadd.f32 1.0, %v1240_v38  ;;  %v1291_v45 = vld [vmem:[#allocation6 + $0x198] sm:$0xff]  ;;  %v1294_v40 = vadd.f32 1.0, %v1257_v39 }
  0x4a   :  { %1856 = vst [vmem:[#allocation87_spill] sm:$0xff] %v1119_v25  ;;  %1857 = vst [vmem:[#allocation88_spill] sm:$0xff] %v1121_v23  ;;  %v1178_v23 = vadd.f32 1.0, %v1151_v9  ;;  %v1187_v25 = vld [vmem:[#allocation6 + $0x100] sm:$0xff]  ;;  %v390_v13 = vmul.f32 1.442695, %v1010_v57 }
  0x4b   :  { %1858 = vst [vmem:[#allocation89_spill] sm:$0xff] %v1134_v14  ;;  %1859 = vst [vmem:[#allocation90_spill] sm:$0xff] %v1136_v15  ;;  %v1181_v14 = vadd.f32 1.0, %v1153_v35  ;;  %v1204_v15 = vld [vmem:[#allocation6 + $0x118] sm:$0xff]  ;;  %v1321_v17 = vld [vmem:[#allocation6 + $0x1a8] sm:$0xff] }
  0x4c   :  { %1860 = vst [vmem:[#allocation91_spill] sm:$0xff] %v1138_v28  ;;  %1861 = vst [vmem:[#allocation92_spill] sm:$0xff] %v1151_v9  ;;  %v1195_v28 = vadd.f32 1.0, %v1168_v8  ;;  %v1198_v9 = vadd.f32 1.0, %v1170_v63  ;;  %v1335_v57 = vadd.f32 1.0, %v1321_v17  ;;  %v1924_v34 = vld [vmem:[#allocation71_spill] sm:$0xff] }
  0x4d   :  { %1862 = vst [vmem:[#allocation93_spill] sm:$0xff] %v1153_v35  ;;  %1863 = vst [vmem:[#allocation94_spill] sm:$0xff] %v1155_v29  ;;  %v1212_v29 = vadd.f32 1.0, %v1185_v0  ;;  %v1221_v35 = vld [vmem:[#allocation6 + $0x130] sm:$0xff] }
  0x4e   :  { %1864 = vst [vmem:[#allocation95_spill] sm:$0xff] %v1168_v8  ;;  %1865 = vst [vmem:[#allocation96_spill] sm:$0xff] %v1170_v63  ;;  %v1215_v8 = vadd.f32 1.0, %v1187_v25  ;;  %v1238_v63 = vld [vmem:[#allocation6 + $0x148] sm:$0xff] }
  0x4f   :  { %1866 = vst [vmem:[#allocation97_spill] sm:$0xff] %v1172_v30  ;;  %1867 = vst [vmem:[#allocation98_spill] sm:$0xff] %v1181_v14  ;;  %v1202_v14 = vld [vmem:[#allocation6 + $0x110] sm:$0xff] }
  0x50   :  { %1868 = vst [vmem:[#allocation99_spill] sm:$0xff] %v1185_v0  ;;  %1869 = vst [vmem:[#allocation100_spill] sm:$0xff] %v1187_v25  ;;  %v1229_v30 = vadd.f32 1.0, %v1202_v14  ;;  %v1232_v0 = vadd.f32 1.0, %v1204_v15  ;;  %v1255_v25 = vld [vmem:[#allocation6 + $0x160] sm:$0xff] }
  0x51   :  { %1870 = vst [vmem:[#allocation101_spill] sm:$0xff] %v1189_v31  ;;  %1871 = vst [vmem:[#allocation102_spill] sm:$0xff] %v1195_v28 }
  0x52   :  { %1872 = vst [vmem:[#allocation103_spill] sm:$0xff] %v1198_v9  ;;  %1873 = vst [vmem:[#allocation104_spill] sm:$0xff] %v1202_v14  ;;  %v1219_v9 = vld [vmem:[#allocation6 + $0x128] sm:$0xff]  ;;  %v1249_v14 = vadd.f32 1.0, %v1221_v35 }
  0x53   :  { %1874 = vst [vmem:[#allocation105_spill] sm:$0xff] %v1204_v15  ;;  %1875 = vst [vmem:[#allocation106_spill] sm:$0xff] %v1206_v36  ;;  %v1246_v31 = vadd.f32 1.0, %v1219_v9  ;;  %v1272_v15 = vld [vmem:[#allocation6 + $0x178] sm:$0xff] }
  0x54   :  { %1876 = vst [vmem:[#allocation107_spill] sm:$0xff] %v1209_v19  ;;  %1877 = vst [vmem:[#allocation108_spill] sm:$0xff] %v1212_v29 }
  0x55   :  { %1878 = vst [vmem:[#allocation109_spill] sm:$0xff] %v1215_v8  ;;  %1879 = vst [vmem:[#allocation110_spill] sm:$0xff] %v1219_v9  ;;  %v1236_v8 = vld [vmem:[#allocation6 + $0x140] sm:$0xff]  ;;  %v1266_v9 = vadd.f32 1.0, %v1238_v63 }
  0x56   :  { %1880 = vst [vmem:[#allocation111_spill] sm:$0xff] %v1221_v35  ;;  %1881 = vst [vmem:[#allocation112_spill] sm:$0xff] %v1223_v37  ;;  %v1263_v36 = vadd.f32 1.0, %v1236_v8  ;;  %v1289_v35 = vld [vmem:[#allocation6 + $0x190] sm:$0xff] }
  0x57   :  { %1882 = vst [vmem:[#allocation113_spill] sm:$0xff] %v1226_v42  ;;  %1883 = vst [vmem:[#allocation114_spill] sm:$0xff] %v1229_v30 }
  0x58   :  { %1884 = vst [vmem:[#allocation115_spill] sm:$0xff] %v1232_v0  ;;  %1885 = vst [vmem:[#allocation116_spill] sm:$0xff] %v1236_v8  ;;  %v1253_v0 = vld [vmem:[#allocation6 + $0x158] sm:$0xff]  ;;  %v1283_v8 = vadd.f32 1.0, %v1255_v25 }
  0x59   :  { %1886 = vst [vmem:[#allocation117_spill] sm:$0xff] %v1238_v63  ;;  %1887 = vst [vmem:[#allocation118_spill] sm:$0xff] %v1240_v38  ;;  %v1280_v37 = vadd.f32 1.0, %v1253_v0  ;;  %v1307_v63 = vadd.f32 1.0, %v1274_v44 }
  0x5a   :  { %1888 = vst [vmem:[#allocation119_spill] sm:$0xff] %v1243_v5  ;;  %1889 = vst [vmem:[#allocation120_spill] sm:$0xff] %v1246_v31  ;;  %v1967_v5 = vld [vmem:[#allocation58_spill] sm:$0xff] }
  0x5b   :  { %1890 = vst [vmem:[#allocation121_spill] sm:$0xff] %v1249_v14  ;;  %1891 = vst [vmem:[#allocation122_spill] sm:$0xff] %v1253_v0  ;;  %v1270_v14 = vld [vmem:[#allocation6 + $0x170] sm:$0xff]  ;;  %v1300_v0 = vadd.f32 1.0, %v1272_v15  ;;  %v1970_v31 = vld [vmem:[#allocation62_spill] sm:$0xff] }
  0x5c   :  { %1892 = vst [vmem:[#allocation123_spill] sm:$0xff] %v1255_v25  ;;  %1893 = vst [vmem:[#allocation124_spill] sm:$0xff] %v1257_v39  ;;  %v1297_v38 = vadd.f32 1.0, %v1270_v14  ;;  %v1313_v39 = vadd.f32 1.0, %v1289_v35  ;;  %v392_v25 = vmul.f32 1.442695, %v1021_v20 }
  0x5d   :  { %1894 = vst [vmem:[#allocation125_spill] sm:$0xff] %v1260_v55  ;;  %1895 = vst [vmem:[#allocation126_spill] sm:$0xff] %v1263_v36  ;;  %v1921_v20 = vld [vmem:[#allocation26_spill] sm:$0xff]  ;;  %v1962_v55 = vld [vmem:[#allocation91_spill] sm:$0xff] }
  0x5e   :  { %1896 = vst [vmem:[#allocation127_spill] sm:$0xff] %v1266_v9  ;;  %1897 = vst [vmem:[#allocation128_spill] sm:$0xff] %v1270_v14  ;;  %v1287_v9 = vld [vmem:[#allocation6 + $0x188] sm:$0xff]  ;;  %v388_v14 = vmul.f32 1.442695, %v1000_v49 }
  0x5f   :  { %1898 = vst [vmem:[#allocation129_spill] sm:$0xff] %v1272_v15  ;;  %1899 = vst [vmem:[#allocation130_spill] sm:$0xff] %v1277_v50  ;;  %v1310_v46 = vadd.f32 1.0, %v1287_v9  ;;  %v396_v49 = vmul.f32 1.442695, %v1034_v6  ;;  %v1332_v15 = vld [vmem:[#allocation6 + $0x1b8] sm:$0xff] }
  0x60   :  { %1900 = vst [vmem:[#allocation131_spill] sm:$0xff] %v1280_v37  ;;  %1901 = vst [vmem:[#allocation132_spill] sm:$0xff] %v1283_v8  ;;  %v1304_v8 = vld [vmem:[#allocation6 + $0x1a0] sm:$0xff]  ;;  %680 = vpow2.f32 %v388_v14  ;;  %v1344_v14 = vadd.f32 1.0, %v1332_v15  ;;  %v400_v6 = vmul.f32 1.442695, %v1038_v43 }
  0x61   :  { %1902 = vst [vmem:[#allocation133_spill] sm:$0xff] %v1287_v9  ;;  %1903 = vst [vmem:[#allocation134_spill] sm:$0xff] %v1289_v35  ;;  %682 = vpow2.f32 %v390_v13  ;;  %v402_v13 = vmul.f32 1.442695, %v1049_v24  ;;  %v1928_v43 = vld [vmem:[#allocation75_spill] sm:$0xff]  ;;  %v1931_v24 = vld [vmem:[#allocation76_spill] sm:$0xff] }
  0x62   :  { %1904 = vst [vmem:[#allocation135_spill] sm:$0xff] %v1291_v45  ;;  %1905 = vst [vmem:[#allocation136_spill] sm:$0xff] %v1294_v40  ;;  %684 = vpow2.f32 %v392_v25  ;;  %v404_v25 = vmul.f32 1.442695, %v1051_v26  ;;  %v1961_v37 = vld [vmem:[#allocation90_spill] sm:$0xff]  ;;  %v1965_v40 = vld [vmem:[#allocation12_spill] sm:$0xff] }
  0x63   :  { %1906 = vst [vmem:[#allocation137_spill] sm:$0xff] %v1297_v38  ;;  %1907 = vst [vmem:[#allocation138_spill] sm:$0xff] %v1300_v0  ;;  %686 = vpow2.f32 %v394_v47  ;;  %v406_v47 = vmul.f32 1.442695, %v1053_v56  ;;  %v1922_v56 = vld [vmem:[#allocation98_spill] sm:$0xff]  ;;  %v1968_v38 = vld [vmem:[#allocation13_spill] sm:$0xff] }
  0x64   :  { %1908 = vst [vmem:[#allocation139_spill] sm:$0xff] %v1304_v8  ;;  %1909 = vst [vmem:[#allocation140_spill] sm:$0xff] %v1307_v63  ;;  %v1324_v63 = vadd.f32 1.0, %v1291_v45  ;;  %688 = vpow2.f32 %v396_v49  ;;  %v408_v49 = vmul.f32 1.442695, %v1066_v41  ;;  %v1963_v45 = vld [vmem:[#allocation92_spill] sm:$0xff] }
  0x65   :  { %1910 = vst [vmem:[#allocation141_spill] sm:$0xff] %v1310_v46  ;;  %1911 = vst [vmem:[#allocation142_spill] sm:$0xff] %v1313_v39  ;;  %v1327_v46 = vadd.f32 1.0, %v1304_v8  ;;  %v1330_v39 = vld [vmem:[#allocation6 + $0x1b0] sm:$0xff]  ;;  %690 = vpow2.f32 %v398_v21  ;;  %v434_v29 = vmul.f32 1.442695, %v1961_v37 }
  0x66   :  { %1912 = vst [vmem:[#allocation143_spill] sm:$0xff] %v1321_v17  ;;  %1913 = vst [vmem:[#allocation144_spill] sm:$0xff] %v1324_v63  ;;  %v1341_v63 = vadd.f32 1.0, %v1330_v39  ;;  %692 = vpow2.f32 %v400_v6  ;;  %v412_v6 = vmul.f32 1.442695, %v1924_v34  ;;  %v1969_v17 = vsub.f32 %v1967_v5, %v1968_v38  ;;  %v1973_v37 = vld [vmem:[#allocation66_spill] sm:$0xff] }
  0x67   :  { %1914 = vst [vmem:[#allocation145_spill] sm:$0xff] %v1327_v46  ;;  %1915 = vst [vmem:[#allocation146_spill] sm:$0xff] %v1330_v39  ;;  %694 = vpow2.f32 %v402_v13  ;;  %v1920_v46 = vld [vmem:[#allocation70_spill] sm:$0xff]  ;;  %v414_v13 = vmul.f32 1.442695, %v1928_v43  ;;  %v1935_v39 = vld [vmem:[#allocation77_spill] sm:$0xff] }
  0x68   :  { %1916 = vst [vmem:[#allocation147_spill] sm:$0xff] %v1332_v15  ;;  %1917 = vst [vmem:[#allocation148_spill] sm:$0xff] %v1335_v57  ;;  %v410_v21 = vmul.f32 1.442695, %v1920_v46  ;;  %696 = vpow2.f32 %v404_v25  ;;  %v416_v25 = vmul.f32 1.442695, %v1931_v24 }
  0x69   :  { %1918 = vst [vmem:[#allocation149_spill] sm:$0xff] %v1341_v63  ;;  %1919 = vst [vmem:[#allocation150_spill] sm:$0xff] %v1344_v14  ;;  %v1923_v14 = vld [vmem:[#allocation27_spill] sm:$0xff]  ;;  %698 = vpow2.f32 %v406_v47  ;;  %v418_v47 = vmul.f32 1.442695, %v1935_v39  ;;  %v1939_v57 = vld [vmem:[#allocation81_spill] sm:$0xff] }
  0x6a   :  { %700 = vpow2.f32 %v408_v49  ;;  %v420_v49 = vmul.f32 1.442695, %v1939_v57  ;;  %v436_v42 = vmul.f32 1.442695, %v1962_v55  ;;  %v1974_v55 = vld [vmem:[#allocation15_spill] sm:$0xff] }
  0x6b   :  { %702 = vpow2.f32 %v410_v21  ;;  %v1942_v21 = vld [vmem:[#allocation82_spill] sm:$0xff]  ;;  %v1975_v30 = vsub.f32 %v1973_v37, %v1974_v55  ;;  %v1976_v34 = vld [vmem:[#allocation67_spill] sm:$0xff] }
  0x6c   :  { %704 = vpow2.f32 %v412_v6  ;;  %v422_v41 = vmul.f32 1.442695, %v1942_v21  ;;  %v1946_v6 = vld [vmem:[#allocation83_spill] sm:$0xff] }
  0x6d   :  { %v681_v8 = vpop.eup %680  ;;  %706 = vpow2.f32 %v414_v13  ;;  %v424_v57 = vmul.f32 1.442695, %v1946_v6  ;;  %v1950_v13 = vld [vmem:[#allocation86_spill] sm:$0xff] }
  0x6e   :  { %v683_v39 = vpop.eup %682  ;;  %708 = vpow2.f32 %v416_v25  ;;  %v426_v21 = vmul.f32 1.442695, %v1950_v13  ;;  %v1953_v25 = vld [vmem:[#allocation87_spill] sm:$0xff] }
  0x6f   :  { %v685_v26 = vpop.eup %684  ;;  %710 = vpow2.f32 %v418_v47  ;;  %v428_v6 = vmul.f32 1.442695, %v1953_v25  ;;  %v1957_v47 = vld [vmem:[#allocation88_spill] sm:$0xff] }
  0x70   :  { %v687_v35 = vpop.eup %686  ;;  %712 = vpow2.f32 %v420_v49  ;;  %v430_v13 = vmul.f32 1.442695, %v1957_v47  ;;  %v1960_v49 = vld [vmem:[#allocation89_spill] sm:$0xff]  ;;  %v1964_v47 = vld [vmem:[#allocation54_spill] sm:$0xff] }
  0x71   :  { %v689_v15 = vpop.eup %688  ;;  %714 = vpow2.f32 %v422_v41  ;;  %v432_v25 = vmul.f32 1.442695, %v1960_v49  ;;  %v438_v41 = vmul.f32 1.442695, %v1963_v45  ;;  %v1966_v50 = vsub.f32 %v1964_v47, %v1965_v40  ;;  %v1971_v49 = vld [vmem:[#allocation14_spill] sm:$0xff]  ;;  %v1979_v40 = vld [vmem:[#allocation68_spill] sm:$0xff] }
  0x72   :  { %v691_v24 = vpop.eup %690  ;;  %716 = vpow2.f32 %v424_v57  ;;  %v517_v57 = vsub.f32 %v1969_v17, %v683_v39  ;;  %v1972_v0 = vsub.f32 %v1970_v31, %v1971_v49  ;;  %v519_v45 = vsub.f32 %v1975_v30, %v687_v35  ;;  %v1982_v17 = vld [vmem:[#allocation93_spill] sm:$0xff]  ;;  %v1983_v31 = vld [vmem:[#allocation94_spill] sm:$0xff]  ;;  %v1988_v35 = vld [vmem:[#allocation19_spill] sm:$0xff] }
  0x73   :  { %v693_v9 = vpop.eup %692  ;;  %718 = vpow2.f32 %v426_v21  ;;  %v516_v43 = vsub.f32 %v1966_v50, %v681_v8  ;;  %v1980_v8 = vld [vmem:[#allocation17_spill] sm:$0xff]  ;;  %v440_v5 = vmul.f32 1.442695, %v1982_v17  ;;  %v1985_v39 = vld [vmem:[#allocation18_spill] sm:$0xff]  ;;  %v1993_v17 = vld [vmem:[#allocation20_spill] sm:$0xff] }
  0x74   :  { %v695_v46 = vpop.eup %694  ;;  %720 = vpow2.f32 %v428_v6  ;;  %v518_v21 = vsub.f32 %v1972_v0, %v685_v26  ;;  %v1977_v6 = vld [vmem:[#allocation16_spill] sm:$0xff]  ;;  %v1981_v50 = vsub.f32 %v1979_v40, %v1980_v8  ;;  %v442_v0 = vmul.f32 1.442695, %v1983_v31  ;;  %v1987_v30 = vld [vmem:[#allocation73_spill] sm:$0xff] }
  0x75   :  { %v697_v36 = vpop.eup %696  ;;  %722 = vpow2.f32 %v430_v13  ;;  %v1978_v19 = vsub.f32 %v1976_v34, %v1977_v6  ;;  %v1984_v26 = vld [vmem:[#allocation72_spill] sm:$0xff]  ;;  %v1989_v34 = vsub.f32 %v1987_v30, %v1988_v35  ;;  %v613_v55 = vadd.f32 %v519_v45, %v517_v57  ;;  %v1998_v57 = vld [vmem:[#allocation97_spill] sm:$0xff]  ;;  %v2000_v35 = vld [vmem:[#allocation79_spill] sm:$0xff] }
  0x76   :  { %v521_v47 = vsub.f32 %v1981_v50, %v691_v24  ;;  %v699_v38 = vpop.eup %698  ;;  %724 = vpow2.f32 %v432_v25  ;;  %v1986_v13 = vsub.f32 %v1984_v26, %v1985_v39  ;;  %v1990_v24 = vld [vmem:[#allocation95_spill] sm:$0xff]  ;;  %v1991_v40 = vld [vmem:[#allocation96_spill] sm:$0xff]  ;;  %v1992_v50 = vld [vmem:[#allocation74_spill] sm:$0xff] }
  0x77   :  { %v520_v63 = vsub.f32 %v1978_v19, %v689_v15  ;;  %v701_v37 = vpop.eup %700  ;;  %726 = vpow2.f32 %v434_v29  ;;  %v523_v15 = vsub.f32 %v1989_v34, %v695_v46  ;;  %v582_v19 = vadd.f32 %v518_v21, %v516_v43  ;;  %v1996_v29 = vld [vmem:[#allocation21_spill] sm:$0xff]  ;;  %v1999_v21 = vld [vmem:[#allocation99_spill] sm:$0xff]  ;;  %v2001_v34 = vld [vmem:[#allocation22_spill] sm:$0xff] }
  0x78   :  { %v522_v49 = vsub.f32 %v1986_v13, %v693_v9  ;;  %v703_v6 = vpop.eup %702  ;;  %728 = vpow2.f32 %v436_v42  ;;  %v444_v25 = vmul.f32 1.442695, %v1990_v24  ;;  %v446_v8 = vmul.f32 1.442695, %v1991_v40  ;;  %v1995_v9 = vld [vmem:[#allocation78_spill] sm:$0xff] }
  0x79   :  { %v1994_v31 = vsub.f32 %v1992_v50, %v1993_v17  ;;  %v705_v26 = vpop.eup %704  ;;  %730 = vpow2.f32 %v438_v41  ;;  %v1997_v39 = vsub.f32 %v1995_v9, %v1996_v29  ;;  %v583_v30 = vadd.f32 %v582_v19, %v520_v63  ;;  %v2004_v41 = vld [vmem:[#allocation23_spill] sm:$0xff]  ;;  %v2007_v19 = vld [vmem:[#allocation101_spill] sm:$0xff]  ;;  %v2008_v29 = vld [vmem:[#allocation84_spill] sm:$0xff] }
  0x7a   :  { %v614_v46 = vadd.f32 %v613_v55, %v521_v47  ;;  %v707_v43 = vpop.eup %706  ;;  %732 = vpow2.f32 %v440_v5  ;;  %v448_v42 = vmul.f32 1.442695, %v1998_v57  ;;  %v450_v45 = vmul.f32 1.442695, %v1999_v21  ;;  %v2006_v47 = vld [vmem:[#allocation100_spill] sm:$0xff] }
  0x7b   :  { %v524_v28 = vsub.f32 %v1994_v31, %v697_v36  ;;  %v525_v13 = vsub.f32 %v1997_v39, %v699_v38  ;;  %v2002_v24 = vsub.f32 %v2000_v35, %v2001_v34  ;;  %v709_v50 = vpop.eup %708  ;;  %734 = vpow2.f32 %v442_v0  ;;  %v2003_v36 = vld [vmem:[#allocation80_spill] sm:$0xff]  ;;  %v2012_v0 = vld [vmem:[#allocation25_spill] sm:$0xff] }
  0x7c   :  { %v2005_v17 = vsub.f32 %v2003_v36, %v2004_v41  ;;  %v584_v9 = vadd.f32 %v583_v30, %v522_v49  ;;  %v615_v38 = vadd.f32 %v614_v46, %v523_v15  ;;  %v711_v63 = vpop.eup %710  ;;  %736 = vpow2.f32 %v444_v25  ;;  %v2009_v39 = vld [vmem:[#allocation24_spill] sm:$0xff]  ;;  %v2015_v30 = vld [vmem:[#allocation105_spill] sm:$0xff] }
  0x7d   :  { %v526_v40 = vsub.f32 %v2002_v24, %v701_v37  ;;  %v452_v5 = vmul.f32 1.442695, %v2006_v47  ;;  %v454_v55 = vmul.f32 1.442695, %v2007_v19  ;;  %v2010_v57 = vsub.f32 %v2008_v29, %v2009_v39  ;;  %v713_v35 = vpop.eup %712  ;;  %v2011_v37 = vld [vmem:[#allocation85_spill] sm:$0xff]  ;;  %v2014_v15 = vld [vmem:[#allocation104_spill] sm:$0xff] }
  0x7e   :  { %v527_v31 = vsub.f32 %v2005_v17, %v703_v6  ;;  %738 = vpow2.f32 %v446_v8  ;;  %v2013_v34 = vsub.f32 %v2011_v37, %v2012_v0  ;;  %v585_v36 = vadd.f32 %v584_v9, %v524_v28  ;;  %v715_v49 = vpop.eup %714  ;;  %v2019_v9 = vld [vmem:[#allocation110_spill] sm:$0xff] }
  0x7f   :  { %v528_v21 = vsub.f32 %v2010_v57, %v705_v26  ;;  %v616_v6 = vadd.f32 %v615_v38, %v525_v13  ;;  %740 = vpow2.f32 %v448_v42  ;;  %v456_v25 = vmul.f32 1.442695, %v2014_v15  ;;  %v717_v47 = vpop.eup %716  ;;  %v2018_v13 = vld [vmem:[#allocation106_spill] sm:$0xff] }
  0x80   :  { %v529_v24 = vsub.f32 %v2013_v34, %v707_v43  ;;  %v458_v46 = vmul.f32 1.442695, %v2015_v30  ;;  %v2016_v41 = vsub.f32 %v1113_v16, %v928_v51  ;;  %742 = vpow2.f32 %v450_v45  ;;  %v719_v28 = vpop.eup %718  ;;  %v2027_v34 = vld [vmem:[#allocation117_spill] sm:$0xff] }
  0x81   :  { %v2017_v8 = vsub.f32 %v1124_v32, %v930_v52  ;;  %v586_v19 = vadd.f32 %v585_v36, %v526_v40  ;;  %v617_v43 = vadd.f32 %v616_v6, %v527_v31  ;;  %744 = vpow2.f32 %v452_v5  ;;  %v721_v51 = vpop.eup %720 }
  0x82   :  { %v530_v17 = vsub.f32 %v2016_v41, %v709_v50  ;;  %v460_v42 = vmul.f32 1.442695, %v2018_v13  ;;  %v462_v38 = vmul.f32 1.442695, %v2019_v9  ;;  %v2020_v29 = vsub.f32 %v1127_v10, %v932_v53  ;;  %v723_v40 = vpop.eup %722  ;;  %v2022_v50 = vld [vmem:[#allocation111_spill] sm:$0xff] }
  0x83   :  { %v531_v26 = vsub.f32 %v2017_v8, %v711_v63  ;;  %746 = vpow2.f32 %v454_v55  ;;  %v2021_v16 = vsub.f32 %v1130_v12, %v934_v54  ;;  %v587_v52 = vadd.f32 %v586_v19, %v528_v21  ;;  %v2023_v63 = vld [vmem:[#allocation112_spill] sm:$0xff]  ;;  %v725_v53 = vpop.eup %724  ;;  %v2034_v19 = vld [vmem:[#allocation123_spill] sm:$0xff] }
  0x84   :  { %v532_v39 = vsub.f32 %v2020_v29, %v713_v35  ;;  %v618_v32 = vadd.f32 %v617_v43, %v529_v24  ;;  %748 = vpow2.f32 %v456_v25  ;;  %v464_v31 = vmul.f32 1.442695, %v2022_v50  ;;  %v727_v21 = vpop.eup %726  ;;  %v2026_v35 = vld [vmem:[#allocation116_spill] sm:$0xff]  ;;  %v2030_v25 = vld [vmem:[#allocation118_spill] sm:$0xff] }
  0x85   :  { %v533_v45 = vsub.f32 %v2021_v16, %v715_v49  ;;  %v466_v5 = vmul.f32 1.442695, %v2023_v63  ;;  %v2024_v57 = vsub.f32 %v1141_v48, %v936_v58  ;;  %750 = vpow2.f32 %v458_v46  ;;  %v729_v58 = vpop.eup %728  ;;  %v2031_v46 = vld [vmem:[#allocation122_spill] sm:$0xff]  ;;  %v2039_v16 = vld [vmem:[#allocation129_spill] sm:$0xff] }
  0x86   :  { %v2025_v10 = vsub.f32 %v1144_v62, %v938_v59  ;;  %v588_v54 = vadd.f32 %v587_v52, %v530_v17  ;;  %v619_v12 = vadd.f32 %v618_v32, %v531_v26  ;;  %752 = vpow2.f32 %v460_v42  ;;  %v731_v15 = vpop.eup %730  ;;  %v2042_v63 = vld [vmem:[#allocation133_spill] sm:$0xff] }
  0x87   :  { %v534_v37 = vsub.f32 %v2024_v57, %v717_v47  ;;  %v468_v0 = vmul.f32 1.442695, %v2026_v35  ;;  %v470_v24 = vmul.f32 1.442695, %v2027_v34  ;;  %v2028_v36 = vsub.f32 %v1147_v18, %v940_v60  ;;  %v733_v60 = vpop.eup %732  ;;  %v2043_v57 = vld [vmem:[#allocation102_spill] sm:$0xff]  ;;  %v2050_v34 = vld [vmem:[#allocation135_spill] sm:$0xff] }
  0x88   :  { %v535_v55 = vsub.f32 %v2025_v10, %v719_v28  ;;  %754 = vpow2.f32 %v462_v38  ;;  %v2029_v48 = vsub.f32 %v1158_v7, %v942_v61  ;;  %v589_v59 = vadd.f32 %v588_v54, %v532_v39  ;;  %v735_v26 = vpop.eup %734  ;;  %v2035_v28 = vld [vmem:[#allocation124_spill] sm:$0xff]  ;;  %v2049_v35 = vld [vmem:[#allocation134_spill] sm:$0xff] }
  0x89   :  { %v536_v6 = vsub.f32 %v2028_v36, %v721_v51  ;;  %v620_v62 = vadd.f32 %v619_v12, %v533_v45  ;;  %756 = vpow2.f32 %v464_v31  ;;  %v472_v30 = vmul.f32 1.442695, %v2030_v25  ;;  %v2038_v39 = vld [vmem:[#allocation128_spill] sm:$0xff]  ;;  %v2052_v36 = vld [vmem:[#allocation30_spill] sm:$0xff] }
  0x8a   :  { %v537_v49 = vsub.f32 %v2029_v48, %v723_v40  ;;  %v474_v41 = vmul.f32 1.442695, %v2031_v46  ;;  %v2032_v17 = vsub.f32 %v1161_v22, %v944_v1  ;;  %758 = vpow2.f32 %v466_v5  ;;  %v737_v22 = vpop.eup %736 }
  0x8b   :  { %v2033_v18 = vsub.f32 %v1164_v11, %v946_v2  ;;  %v590_v61 = vadd.f32 %v589_v59, %v534_v37  ;;  %v621_v7 = vadd.f32 %v620_v62, %v535_v55  ;;  %760 = vpow2.f32 %v468_v0  ;;  %v739_v29 = vpop.eup %738  ;;  %v2044_v37 = vld [vmem:[#allocation28_spill] sm:$0xff]  ;;  %v2047_v55 = vld [vmem:[#allocation29_spill] sm:$0xff]  ;;  %v2055_v59 = vld [vmem:[#allocation31_spill] sm:$0xff] }
  0x8c   :  { %v538_v47 = vsub.f32 %v2032_v17, %v725_v53  ;;  %v476_v43 = vmul.f32 1.442695, %v2034_v19  ;;  %v478_v13 = vmul.f32 1.442695, %v2035_v28  ;;  %v2036_v42 = vsub.f32 %v1175_v27, %v948_v3  ;;  %v741_v3 = vpop.eup %740  ;;  %v1557_v19 = vld [vmem:[#allocation6 + $0x1c0] sm:$0xff]  ;;  %v2062_v28 = vld [vmem:[#allocation113_spill] sm:$0xff] }
  0x8d   :  { %v539_v8 = vsub.f32 %v2033_v18, %v727_v21  ;;  %762 = vpow2.f32 %v470_v24  ;;  %v2037_v1 = vsub.f32 %v1178_v23, %v950_v4  ;;  %v591_v2 = vadd.f32 %v590_v61, %v536_v6  ;;  %v743_v50 = vpop.eup %742  ;;  %v2051_v24 = vld [vmem:[#allocation107_spill] sm:$0xff]  ;;  %v2059_v18 = vld [vmem:[#allocation109_spill] sm:$0xff] }
  0x8e   :  { %v540_v9 = vsub.f32 %v2036_v42, %v729_v58  ;;  %v622_v11 = vadd.f32 %v621_v7, %v537_v49  ;;  %764 = vpow2.f32 %v472_v30  ;;  %v480_v51 = vmul.f32 1.442695, %v2038_v39  ;;  %v2054_v49 = vld [vmem:[#allocation108_spill] sm:$0xff] }
  0x8f   :  { %v541_v38 = vsub.f32 %v2037_v1, %v731_v15  ;;  %v482_v45 = vmul.f32 1.442695, %v2039_v16  ;;  %v2040_v52 = vsub.f32 %v1922_v56, %v1921_v20  ;;  %766 = vpow2.f32 %v474_v41  ;;  %v745_v20 = vpop.eup %744  ;;  %v2046_v56 = vld [vmem:[#allocation103_spill] sm:$0xff]  ;;  %v2068_v16 = vld [vmem:[#allocation34_spill] sm:$0xff] }
  0x90   :  { %v2041_v27 = vsub.f32 %v1192_v33, %v1923_v14  ;;  %v592_v23 = vadd.f32 %v591_v2, %v538_v47  ;;  %v623_v4 = vadd.f32 %v622_v11, %v539_v8  ;;  %768 = vpow2.f32 %v476_v43  ;;  %v747_v21 = vpop.eup %746  ;;  %v2057_v41 = vld [vmem:[#allocation139_spill] sm:$0xff]  ;;  %v2060_v8 = vld [vmem:[#allocation32_spill] sm:$0xff]  ;;  %v2065_v2 = vld [vmem:[#allocation146_spill] sm:$0xff] }
  0x91   :  { %v542_v32 = vsub.f32 %v2040_v52, %v733_v60  ;;  %v484_v31 = vmul.f32 1.442695, %v1274_v44  ;;  %v486_v5 = vmul.f32 1.442695, %v2042_v63  ;;  %v2045_v53 = vsub.f32 %v2043_v57, %v2044_v37  ;;  %v749_v48 = vpop.eup %748  ;;  %v2058_v47 = vld [vmem:[#allocation143_spill] sm:$0xff] }
  0x92   :  { %v543_v40 = vsub.f32 %v2041_v27, %v735_v26  ;;  %770 = vpow2.f32 %v478_v13  ;;  %v2048_v54 = vsub.f32 %v2046_v56, %v2047_v55  ;;  %v593_v33 = vadd.f32 %v592_v23, %v540_v9  ;;  %v751_v46 = vpop.eup %750  ;;  %v1559_v43 = vld [vmem:[#allocation6 + $0x1c8] sm:$0xff]  ;;  %v2063_v13 = vld [vmem:[#allocation33_spill] sm:$0xff] }
  0x93   :  { %v544_v10 = vsub.f32 %v2045_v53, %v737_v22  ;;  %v624_v14 = vadd.f32 %v623_v4, %v541_v38  ;;  %772 = vpow2.f32 %v480_v51  ;;  %v488_v0 = vmul.f32 1.442695, %v2049_v35  ;;  %v753_v26 = vpop.eup %752  ;;  %v2067_v51 = vld [vmem:[#allocation114_spill] sm:$0xff]  ;;  %v1571_v27 = vld [vmem:[#allocation6 + $0x1d8] sm:$0xff]  ;;  %v2071_v23 = vld [vmem:[#allocation35_spill] sm:$0xff] }
  0x94   :  { %v545_v12 = vsub.f32 %v2048_v54, %v739_v29  ;;  %v490_v44 = vmul.f32 1.442695, %v2050_v34  ;;  %v2053_v6 = vsub.f32 %v2051_v24, %v2052_v36  ;;  %774 = vpow2.f32 %v482_v45  ;;  %v2066_v29 = vld [vmem:[#allocation147_spill] sm:$0xff]  ;;  %v1581_v54 = vld [vmem:[#allocation6 + $0x1e0] sm:$0xff] }
  0x95   :  { %v2056_v62 = vsub.f32 %v2054_v49, %v2055_v59  ;;  %v594_v25 = vadd.f32 %v593_v33, %v542_v32  ;;  %v625_v30 = vadd.f32 %v624_v14, %v543_v40  ;;  %776 = vpow2.f32 %v484_v31  ;;  %v755_v38 = vpop.eup %754  ;;  %v2070_v40 = vld [vmem:[#allocation115_spill] sm:$0xff]  ;;  %v2076_v33 = vld [vmem:[#allocation120_spill] sm:$0xff]  ;;  %v2077_v14 = vld [vmem:[#allocation37_spill] sm:$0xff] }
  0x96   :  { %v546_v58 = vsub.f32 %v2053_v6, %v741_v3  ;;  %v492_v17 = vmul.f32 1.442695, %v2057_v41  ;;  %v494_v60 = vmul.f32 1.442695, %v2058_v47  ;;  %v2061_v61 = vsub.f32 %v2059_v18, %v2060_v8  ;;  %v757_v32 = vpop.eup %756  ;;  %v1569_v3 = vld [vmem:[#allocation6 + $0x1d0] sm:$0xff]  ;;  %v2073_v53 = vld [vmem:[#allocation119_spill] sm:$0xff] }
  0x97   :  { %v547_v15 = vsub.f32 %v2056_v62, %v743_v50  ;;  %778 = vpow2.f32 %v486_v5  ;;  %v2064_v42 = vsub.f32 %v2062_v28, %v2063_v13  ;;  %v595_v22 = vadd.f32 %v594_v25, %v544_v10  ;;  %v759_v5 = vpop.eup %758  ;;  %v2074_v10 = vld [vmem:[#allocation36_spill] sm:$0xff]  ;;  %v2079_v6 = vld [vmem:[#allocation121_spill] sm:$0xff] }
  0x98   :  { %v548_v7 = vsub.f32 %v2061_v61, %v745_v20  ;;  %v626_v1 = vadd.f32 %v625_v30, %v545_v12  ;;  %780 = vpow2.f32 %v488_v0  ;;  %v496_v11 = vmul.f32 1.442695, %v2065_v2  ;;  %v761_v55 = vpop.eup %760  ;;  %v1583_v12 = vld [vmem:[#allocation6 + $0x1e8] sm:$0xff]  ;;  %v1593_v62 = vld [vmem:[#allocation6 + $0x1f0] sm:$0xff]  ;;  %v2082_v25 = vld [vmem:[#allocation125_spill] sm:$0xff] }
  0x99   :  { %v549_v9 = vsub.f32 %v2064_v42, %v747_v21  ;;  %v498_v39 = vmul.f32 1.442695, %v2066_v29  ;;  %v2069_v45 = vsub.f32 %v2067_v51, %v2068_v16  ;;  %782 = vpow2.f32 %v490_v44  ;;  %v2083_v30 = vld [vmem:[#allocation39_spill] sm:$0xff]  ;;  %v2085_v61 = vld [vmem:[#allocation126_spill] sm:$0xff] }
  0x9a   :  { %v2072_v4 = vsub.f32 %v2070_v40, %v2071_v23  ;;  %v596_v31 = vadd.f32 %v595_v22, %v546_v58  ;;  %v627_v63 = vadd.f32 %v626_v1, %v547_v15  ;;  %784 = vpow2.f32 %v492_v17  ;;  %v763_v44 = vpop.eup %762  ;;  %v2080_v58 = vld [vmem:[#allocation38_spill] sm:$0xff]  ;;  %v1595_v15 = vld [vmem:[#allocation6 + $0x1f8] sm:$0xff]  ;;  %v2088_v42 = vld [vmem:[#allocation127_spill] sm:$0xff] }
  0x9b   :  { %v550_v52 = vsub.f32 %v2069_v45, %v749_v48  ;;  %v500_v57 = vmul.f32 1.442695, %v1557_v19  ;;  %v502_v37 = vmul.f32 1.442695, %v1559_v43  ;;  %v2075_v20 = vsub.f32 %v2073_v53, %v2074_v10  ;;  %v765_v59 = vpop.eup %764  ;;  %v2091_v51 = vld [vmem:[#allocation130_spill] sm:$0xff]  ;;  %v2094_v40 = vld [vmem:[#allocation131_spill] sm:$0xff] }
  0x9c   :  { %v551_v50 = vsub.f32 %v2072_v4, %v751_v46  ;;  %786 = vpow2.f32 %v494_v60  ;;  %v2078_v21 = vsub.f32 %v2076_v33, %v2077_v14  ;;  %v597_v0 = vadd.f32 %v596_v31, %v548_v7  ;;  %v767_v60 = vpop.eup %766  ;;  %v2086_v7 = vld [vmem:[#allocation40_spill] sm:$0xff]  ;;  %v2092_v16 = vld [vmem:[#allocation42_spill] sm:$0xff]  ;;  %v2095_v23 = vld [vmem:[#allocation43_spill] sm:$0xff] }
  0x9d   :  { %v552_v56 = vsub.f32 %v2075_v20, %v753_v26  ;;  %v628_v34 = vadd.f32 %v627_v63, %v549_v9  ;;  %788 = vpow2.f32 %v496_v11  ;;  %v504_v24 = vmul.f32 1.442695, %v1569_v3  ;;  %v769_v13 = vpop.eup %768  ;;  %v2089_v9 = vld [vmem:[#allocation41_spill] sm:$0xff]  ;;  %v2102_v33 = vld [vmem:[#allocation44_spill] sm:$0xff] }
  0x9e   :  { %v553_v35 = vsub.f32 %v2078_v21, %v755_v38  ;;  %v506_v36 = vmul.f32 1.442695, %v1571_v27  ;;  %v2081_v48 = vsub.f32 %v2079_v6, %v2080_v58  ;;  %790 = vpow2.f32 %v498_v39  ;;  %v2099_v10 = vld [vmem:[#allocation49_spill] sm:$0xff] }
  0x9f   :  { %v2084_v46 = vsub.f32 %v2082_v25, %v2083_v30  ;;  %v598_v17 = vadd.f32 %v597_v0, %v550_v52  ;;  %v629_v47 = vadd.f32 %v628_v34, %v551_v50  ;;  %792 = vpow2.f32 %v500_v57  ;;  %v771_v11 = vpop.eup %770  ;;  %v2097_v57 = vld [vmem:[#allocation48_spill] sm:$0xff]  ;;  %v2100_v20 = vld [vmem:[#allocation141_spill] sm:$0xff]  ;;  %v2109_v25 = vld [vmem:[#allocation51_spill] sm:$0xff] }
  0xa0   :  { %v554_v49 = vsub.f32 %v2081_v48, %v757_v32  ;;  %v508_v18 = vmul.f32 1.442695, %v1581_v54  ;;  %v510_v8 = vmul.f32 1.442695, %v1583_v12  ;;  %v2087_v26 = vsub.f32 %v2085_v61, %v2086_v7  ;;  %v773_v32 = vpop.eup %772  ;;  %v2104_v0 = vld [vmem:[#allocation136_spill] sm:$0xff]  ;;  %v2105_v34 = vld [vmem:[#allocation45_spill] sm:$0xff] }
  0xa1   :  { %v555_v41 = vsub.f32 %v2084_v46, %v759_v5  ;;  %794 = vpow2.f32 %v502_v37  ;;  %v2090_v22 = vsub.f32 %v2088_v42, %v2089_v9  ;;  %v599_v38 = vadd.f32 %v598_v17, %v552_v56  ;;  %v775_v5 = vpop.eup %774  ;;  %v2098_v37 = vld [vmem:[#allocation140_spill] sm:$0xff]  ;;  %v2107_v48 = vld [vmem:[#allocation50_spill] sm:$0xff]  ;;  %v2115_v61 = vld [vmem:[#allocation47_spill] sm:$0xff] }
  0xa2   :  { %v556_v28 = vsub.f32 %v2087_v26, %v761_v55  ;;  %v630_v2 = vadd.f32 %v629_v47, %v553_v35  ;;  %796 = vpow2.f32 %v504_v24  ;;  %v512_v29 = vmul.f32 1.442695, %v1593_v62  ;;  %v2101_v55 = vld [vmem:[#allocation132_spill] sm:$0xff]  ;;  %v777_v35 = vpop.eup %776  ;;  %v2112_v17 = vld [vmem:[#allocation46_spill] sm:$0xff] }
  0xa3   :  { %v557_v1 = vsub.f32 %v2090_v22, %v763_v44  ;;  %v514_v39 = vmul.f32 1.442695, %v1595_v15  ;;  %v2093_v45 = vsub.f32 %v2091_v51, %v2092_v16  ;;  %798 = vpow2.f32 %v506_v36  ;;  %v2110_v30 = vld [vmem:[#allocation144_spill] sm:$0xff] }
  0xa4   :  { %v2096_v4 = vsub.f32 %v2094_v40, %v2095_v23  ;;  %v600_v31 = vadd.f32 %v599_v38, %v554_v49  ;;  %v631_v63 = vadd.f32 %v630_v2, %v555_v41  ;;  %v372_v53 = vsub.f32 %v2098_v37, %v2097_v57  ;;  %v779_v58 = vpop.eup %778  ;;  %v2108_v49 = vld [vmem:[#allocation142_spill] sm:$0xff]  ;;  %v2111_v41 = vld [vmem:[#allocation137_spill] sm:$0xff] }
  0xa5   :  { %v558_v52 = vsub.f32 %v2093_v45, %v765_v59  ;;  %v373_v56 = vsub.f32 %v2100_v20, %v2099_v10  ;;  %800 = vpow2.f32 %v508_v18  ;;  %v2103_v14 = vsub.f32 %v2101_v55, %v2102_v33  ;;  %v781_v18 = vpop.eup %780  ;;  %v2118_v38 = vld [vmem:[#allocation145_spill] sm:$0xff] }
  0xa6   :  { %v559_v50 = vsub.f32 %v2096_v4, %v767_v60  ;;  %802 = vpow2.f32 %v510_v8  ;;  %v2106_v44 = vsub.f32 %v2104_v0, %v2105_v34  ;;  %v601_v36 = vadd.f32 %v600_v31, %v556_v28  ;;  %v2114_v8 = vld [vmem:[#allocation138_spill] sm:$0xff]  ;;  %v783_v42 = vpop.eup %782 }
  0xa7   :  { %v560_v21 = vsub.f32 %v2103_v14, %v769_v13  ;;  %v632_v6 = vadd.f32 %v631_v63, %v557_v1  ;;  %v374_v59 = vsub.f32 %v2108_v49, %v2107_v48  ;;  %v375_v46 = vsub.f32 %v2110_v30, %v2109_v25  ;;  %v2117_v1 = vld [vmem:[#allocation52_spill] sm:$0xff]  ;;  %v785_v16 = vpop.eup %784  ;;  %v2124_v63 = vld [vmem:[#allocation150_spill] sm:$0xff]  ;;  %v2125_v14 = vld [vmem:[#allocation57_spill] sm:$0xff] }
  0xa8   :  { %v561_v24 = vsub.f32 %v2106_v44, %v771_v11  ;;  %804 = vpow2.f32 %v512_v29  ;;  %v2113_v47 = vsub.f32 %v2111_v41, %v2112_v17  ;;  %v2116_v7 = vsub.f32 %v2114_v8, %v2115_v61  ;;  %v2119_v11 = vld [vmem:[#allocation53_spill] sm:$0xff]  ;;  %v2120_v29 = vld [vmem:[#allocation148_spill] sm:$0xff] }
  0xa9   :  { %806 = vpow2.f32 %v514_v39  ;;  %v602_v28 = vadd.f32 %v601_v36, %v558_v52  ;;  %v633_v13 = vadd.f32 %v632_v6, %v559_v50  ;;  %v252_v9 = vadd.f32 1.0, %v1557_v19  ;;  %v787_v23 = vpop.eup %786  ;;  %v2121_v50 = vld [vmem:[#allocation55_spill] sm:$0xff]  ;;  %v2122_v19 = vld [vmem:[#allocation149_spill] sm:$0xff]  ;;  %v2127_v48 = vld [vmem:[#allocation60_spill] sm:$0xff] }
  0xaa   :  { %v562_v60 = vsub.f32 %v2113_v47, %v773_v32  ;;  %v563_v26 = vsub.f32 %v2116_v7, %v775_v5  ;;  %v253_v22 = vadd.f32 1.0, %v1559_v43  ;;  %v376_v2 = vsub.f32 %v2118_v38, %v2117_v1  ;;  %v2123_v43 = vld [vmem:[#allocation56_spill] sm:$0xff]  ;;  %v789_v57 = vpop.eup %788  ;;  %v2129_v47 = vld [vmem:[#allocation63_spill] sm:$0xff] }
  0xab   :  { %v377_v51 = vsub.f32 %v2120_v29, %v2119_v11  ;;  %v564_v45 = vsub.f32 %v372_v53, %v777_v35  ;;  %v565_v39 = vsub.f32 %v373_v56, %v779_v58  ;;  %v603_v32 = vadd.f32 %v602_v28, %v560_v21  ;;  %v791_v53 = vpop.eup %790  ;;  %v2126_v21 = vld [vmem:[#allocation59_spill] sm:$0xff] }
  0xac   :  { %v634_v40 = vadd.f32 %v633_v13, %v561_v24  ;;  %v254_v52 = vadd.f32 1.0, %v1569_v3  ;;  %v255_v4 = vadd.f32 1.0, %v1571_v27  ;;  %v378_v31 = vsub.f32 %v2122_v19, %v2121_v50  ;;  %v793_v35 = vpop.eup %792  ;;  %v2131_v13 = vld [vmem:[#allocation65_spill] sm:$0xff] }
  0xad   :  { %v379_v5 = vsub.f32 %v2124_v63, %v2123_v43  ;;  %v566_v37 = vsub.f32 %v374_v59, %v781_v18  ;;  %v567_v10 = vsub.f32 %v375_v46, %v783_v42  ;;  %v604_v20 = vadd.f32 %v603_v32, %v562_v60  ;;  %v2128_v59 = vld [vmem:[#allocation61_spill] sm:$0xff]  ;;  %v2130_v18 = vld [vmem:[#allocation64_spill] sm:$0xff] }
  0xae   :  { %v635_v55 = vadd.f32 %v634_v40, %v563_v26  ;;  %v256_v56 = vadd.f32 1.0, %v1581_v54  ;;  %v257_v33 = vadd.f32 1.0, %v1583_v12  ;;  %v380_v3 = vsub.f32 %v252_v9, %v2125_v14  ;;  %v795_v36 = vpop.eup %794  ;;  %v2132_v9 = vld [vmem:[#allocation69_spill] sm:$0xff] }
  0xaf   :  { %v381_v27 = vsub.f32 %v253_v22, %v2126_v21  ;;  %v568_v0 = vsub.f32 %v376_v2, %v785_v16  ;;  %v569_v34 = vsub.f32 %v377_v51, %v787_v23  ;;  %v605_v44 = vadd.f32 %v604_v20, %v564_v45  ;;  %v797_v25 = vpop.eup %796 }
  0xb0   :  { %v636_v24 = vadd.f32 %v635_v55, %v565_v39  ;;  %v258_v6 = vadd.f32 1.0, %v1593_v62  ;;  %v259_v58 = vadd.f32 1.0, %v1595_v15  ;;  %v382_v49 = vsub.f32 %v254_v52, %v2127_v48  ;;  %v799_v17 = vpop.eup %798 }
  0xb1   :  { %v383_v54 = vsub.f32 %v255_v4, %v2128_v59  ;;  %v570_v12 = vsub.f32 %v378_v31, %v789_v57  ;;  %v571_v30 = vsub.f32 %v379_v5, %v791_v53  ;;  %v606_v46 = vadd.f32 %v605_v44, %v566_v37 }
  0xb2   :  { %v637_v41 = vadd.f32 %v636_v24, %v567_v10  ;;  %v384_v60 = vsub.f32 %v256_v56, %v2129_v47  ;;  %v385_v8 = vsub.f32 %v257_v33, %v2130_v18  ;;  %v801_v61 = vpop.eup %800  ;;  %v572_v7 = vsub.f32 %v380_v3, %v793_v35 }
  0xb3   :  { %v573_v26 = vsub.f32 %v381_v27, %v795_v36  ;;  %v607_v62 = vadd.f32 %v606_v46, %v568_v0  ;;  %v803_v15 = vpop.eup %802  ;;  %v386_v42 = vsub.f32 %v258_v6, %v2131_v13  ;;  %v387_v22 = vsub.f32 %v259_v58, %v2132_v9 }
  0xb4   :  { %v638_v28 = vadd.f32 %v637_v41, %v569_v34  ;;  %v574_v38 = vsub.f32 %v382_v49, %v797_v25  ;;  %v575_v2 = vsub.f32 %v383_v54, %v799_v17  ;;  %v576_v16 = vsub.f32 %v384_v60, %v801_v61 }
  0xb5   :  { %v805_v1 = vpop.eup %804  ;;  %v608_v11 = vadd.f32 %v607_v62, %v570_v12  ;;  %v577_v45 = vsub.f32 %v385_v8, %v803_v15 }
  0xb6   :  { %v639_v29 = vadd.f32 %v638_v28, %v571_v30  ;;  %v807_v51 = vpop.eup %806  ;;  %v578_v40 = vsub.f32 %v386_v42, %v805_v1 }
  0xb7   :  { %v609_v39 = vadd.f32 %v608_v11, %v572_v7  ;;  %v579_v23 = vsub.f32 %v387_v22, %v807_v51 }
  0xb8   :  { %v640_v32 = vadd.f32 %v639_v29, %v573_v26 }
  0xb9   :  { %v610_v52 = vadd.f32 %v609_v39, %v574_v38 }
  0xba   :  { %v641_v4 = vadd.f32 %v640_v32, %v575_v2 }
  0xbb   :  { %v611_v50 = vadd.f32 %v610_v52, %v576_v16 }
  0xbc   :  { %v642_v19 = vadd.f32 %v641_v4, %v577_v45 }
  0xbd   :  { %v612_v31 = vadd.f32 %v611_v50, %v578_v40 }
  0xbe   :  { %v643_v43 = vadd.f32 %v642_v19, %v579_v23 }
  0xbf   :  { %653 = vst [vmem:[#allocation8] sm:$0xff] %v612_v31 }
  0xc0   :  { %654 = vst [vmem:[#allocation8 + $0x8] sm:$0xff] %v643_v43 }
  0xc1   :  { %859 = shalt.err (!%p856_p0)
}
  0xc2   :  { %664 = dma.vmem_to_hbm [thread:$0]  %s662_s1, 256, %s1665_s2, [#allocation5]  }
  0xc3   :  { %872 = dma.done.wait [#allocation5], 256  }
  0xc4   :  { %873 = vsyncadd [#allocation5], 4294967040 }
  0xc5   :  { %668 = vsyncpa [#allocation4], 1 }
  0xc6   :  { %669 = vsyncpa [#allocation7], 1 }
  0xc7   :  { %670 = vsyncpa [#allocation5], 1 }

</bundles_post_ra>
